<compile_context>
chip_gen: v7x
topology: tpu7x:2x2x1
jax: 0.10.0
libtpu: 0.0.40
codegen_flags: <defaults>
</compile_context>

<pallas_src>
import functools

import jax
import jax.numpy as jnp
from jax.experimental import pallas as pl
from jax.experimental.pallas import tpu as pltpu

_LANE = 128
_MAX_TILE_ROWS = 512  # 512*128*4B = 256 KiB per f32 tile -> tiny VMEM footprint


def _gaussian_noise_kernel(x_ref, n_ref, o_ref, sxx_ref, snn_ref, alpha_ref,
                           *, snr_factor):
    p = pl.program_id(0)  # 0 = stats pass, 1 = apply pass
    t = pl.program_id(1)  # tile index

    @pl.when(jnp.logical_and(p == 0, t == 0))
    def _init():
        sxx_ref[...] = jnp.zeros_like(sxx_ref)
        snn_ref[...] = jnp.zeros_like(snn_ref)

    @pl.when(p == 0)
    def _stats():
        x = x_ref[...].astype(jnp.float32)
        n = n_ref[...].astype(jnp.float32)
        sxx_ref[...] += jnp.sum(x * x)
        snn_ref[...] += jnp.sum(n * n)

    @pl.when(jnp.logical_and(p == 1, t == 0))
    def _alpha():
        # E_x = sum(x^2)/N and E_noise = sum(noise^2)/N share the same N, so it
        # cancels: alpha = sqrt(sum(x^2) / (sum(noise^2) * 10**(snr/10))).
        alpha_ref[...] = jnp.sqrt(sxx_ref[...] / (snn_ref[...] * snr_factor))

    @pl.when(p == 1)
    def _apply():
        x = x_ref[...].astype(jnp.float32)
        n = n_ref[...].astype(jnp.float32)
        o_ref[...] = (x + alpha_ref[...] * n).astype(o_ref.dtype)


def gaussian_noise(x, key, *, snr=30.0, mean=0.0, training=True):
    """Pallas implementation of GaussianNoise.forward (training-mode path)."""
    if not training:
        return x

    # TODO(synk): noise is drawn with jax.random (outside the kernel) because
    # pltpu.prng_* has no CPU/interpret lowering; on-HW in-kernel PRNG would
    # save one HBM stream.
    noise = jax.random.normal(key, x.shape, dtype=jnp.float32) + jnp.float32(mean)

    total = x.size
    rows = -(-total // _LANE)              # ceil(total / 128)
    rows = -(-rows // 8) * 8               # sublane-align row count
    tile_r = min(_MAX_TILE_ROWS, rows)
    n_tiles = -(-rows // tile_r)
    padded_rows = n_tiles * tile_r
    pad = padded_rows * _LANE - total      # zero padding: contributes 0 to sums

    xf = jnp.pad(jnp.ravel(x), (0, pad)).reshape(padded_rows, _LANE)
    nf = jnp.pad(jnp.ravel(noise), (0, pad)).reshape(padded_rows, _LANE)

    snr_factor = float(10.0 ** (float(snr) / 10.0))
    itemsize = x.dtype.itemsize
    cost = pl.CostEstimate(
        flops=int(6 * total),
        transcendentals=0,
        # x read twice, noise (f32) read twice, out written once.
        bytes_accessed=int(padded_rows * _LANE * (2 * itemsize + 2 * 4 + itemsize)),
    )

    out = pl.pallas_call(
        functools.partial(_gaussian_noise_kernel, snr_factor=snr_factor),
        out_shape=jax.ShapeDtypeStruct((padded_rows, _LANE), x.dtype),
        grid_spec=pltpu.PrefetchScalarGridSpec(
            num_scalar_prefetch=0,
            grid=(2, n_tiles),                       # (pass, tile)
            in_specs=[
                pl.BlockSpec((tile_r, _LANE), lambda p, t: (t, 0)),
                pl.BlockSpec((tile_r, _LANE), lambda p, t: (t, 0)),
            ],
            # Pin the output block to 0 during the stats pass so no garbage
            # blocks are written back; the apply pass walks all tiles.
            out_specs=pl.BlockSpec((tile_r, _LANE), lambda p, t: (p * t, 0)),
            scratch_shapes=[
                pltpu.VMEM((1, 1), jnp.float32),     # sum(x^2)
                pltpu.VMEM((1, 1), jnp.float32),     # sum(noise^2)
                pltpu.VMEM((1, 1), jnp.float32),     # alpha
            ],
        ),
        compiler_params=pltpu.CompilerParams(
            dimension_semantics=("arbitrary", "arbitrary")),
        cost_estimate=cost,
    )(xf, nf)

    return out.reshape(-1)[:total].reshape(x.shape)


if __name__ == "__main__":
    key = jax.random.PRNGKey(0)
    kx, kn = jax.random.split(key)
    x = jax.random.normal(kx, (2, 4, 16, 16), dtype=jnp.float32)  # NCHW

    y = gaussian_noise(x, kn, snr=30.0, mean=0.0, training=True)
    y = jax.block_until_ready(y)

    assert y.shape == x.shape and y.dtype == x.dtype

    # Pure-JAX reference with the identical noise draw.
    noise = jax.random.normal(kn, x.shape, dtype=jnp.float32)
    alpha = jnp.sqrt(jnp.sum(x * x) / (jnp.sum(noise * noise) * 10.0 ** (30.0 / 10.0)))
    y_ref = x + alpha * noise
    assert jnp.allclose(y, y_ref, rtol=1e-4, atol=1e-5), float(
        jnp.max(jnp.abs(y - y_ref)))

    # By construction of alpha, the measured SNR matches the target exactly
    # (up to fp32 roundoff).
    d = y - x
    snr_meas = 10.0 * jnp.log10(jnp.sum(x * x) / jnp.sum(d * d))
    assert jnp.abs(snr_meas - 30.0) < 1e-2, snr_meas

    # Eval mode is the identity.
    assert gaussian_noise(x, kn, training=False) is x

    print("KERNEL_OK")
</pallas_src>

<mosaic_0001>
module attributes {stable_mosaic.version = 11 : i64} {
  func.func @_gaussian_noise_kernel(%arg0: i32, %arg1: i32, %arg2: memref<16x128xf32, #tpu.memory_space<vmem>>, %arg3: memref<16x128xf32, #tpu.memory_space<vmem>>, %arg4: memref<16x128xf32, #tpu.memory_space<vmem>>, %arg5: memref<1x1xf32, #tpu.memory_space<vmem>>, %arg6: memref<1x1xf32, #tpu.memory_space<vmem>>, %arg7: memref<1x1xf32, #tpu.memory_space<vmem>>) attributes {dimension_semantics = [#tpu.dimension_semantics<arbitrary>, #tpu.dimension_semantics<arbitrary>], iteration_bounds = array<i64: 2, 1>, scalar_prefetch = 0 : i64, scratch_operands = 3 : i64, tpu.core_type = #tpu.core_type<tc>, window_params = [{transform_indices = @transform_0, window_bounds = array<i64: 16, 128>}, {transform_indices = @transform_1, window_bounds = array<i64: 16, 128>}, {transform_indices = @transform_2, window_bounds = array<i64: 16, 128>}]} {
    %c0_i32 = arith.constant 0 : i32
    %0 = arith.cmpi eq, %arg0, %c0_i32 : i32
    %c0_i32_0 = arith.constant 0 : i32
    %1 = arith.cmpi eq, %arg1, %c0_i32_0 : i32
    %2 = arith.andi %0, %1 : i1
    %3 = arith.extui %2 : i1 to i32
    %c0_i32_1 = arith.constant 0 : i32
    %4 = arith.cmpi ne, %3, %c0_i32_1 : i32
    scf.if %4 {
      %cst = arith.constant 0.000000e+00 : f32
      %16 = vector.broadcast %cst : f32 to vector<1x1xf32>
      %c0 = arith.constant 0 : index
      %c0_8 = arith.constant 0 : index
      %17 = vector.load %arg5[%c0, %c0_8] : memref<1x1xf32, #tpu.memory_space<vmem>>, vector<1x1xf32>
      tpu.vector_store %arg5[%c0, %c0_8], %16 {strides = array<i32>} : memref<1x1xf32, #tpu.memory_space<vmem>>, vector<1x1xf32>,
      %cst_9 = arith.constant 0.000000e+00 : f32
      %18 = vector.broadcast %cst_9 : f32 to vector<1x1xf32>
      %c0_10 = arith.constant 0 : index
      %c0_11 = arith.constant 0 : index
      %19 = vector.load %arg6[%c0_10, %c0_11] : memref<1x1xf32, #tpu.memory_space<vmem>>, vector<1x1xf32>
      tpu.vector_store %arg6[%c0_10, %c0_11], %18 {strides = array<i32>} : memref<1x1xf32, #tpu.memory_space<vmem>>, vector<1x1xf32>,
    } else {
    }
    %c0_i32_2 = arith.constant 0 : i32
    %5 = arith.cmpi eq, %arg0, %c0_i32_2 : i32
    %6 = arith.extui %5 : i1 to i32
    %c0_i32_3 = arith.constant 0 : i32
    %7 = arith.cmpi ne, %6, %c0_i32_3 : i32
    scf.if %7 {
      %c0 = arith.constant 0 : index
      %c0_8 = arith.constant 0 : index
      %16 = vector.load %arg2[%c0, %c0_8] : memref<16x128xf32, #tpu.memory_space<vmem>>, vector<16x128xf32>
      %c0_9 = arith.constant 0 : index
      %c0_10 = arith.constant 0 : index
      %17 = vector.load %arg3[%c0_9, %c0_10] : memref<16x128xf32, #tpu.memory_space<vmem>>, vector<16x128xf32>
      %c0_11 = arith.constant 0 : index
      %c0_12 = arith.constant 0 : index
      %18 = vector.load %arg5[%c0_11, %c0_12] : memref<1x1xf32, #tpu.memory_space<vmem>>, vector<1x1xf32>
      %19 = arith.mulf %16, %16 : vector<16x128xf32>
      %20 = vector.shape_cast %19 : vector<16x128xf32> to vector<1x16x128xf32>
      %cst = arith.constant dense<0.000000e+00> : vector<1xf32>
      %21 = vector.multi_reduction <add>, %20, %cst [1, 2] : vector<1x16x128xf32> to vector<1xf32>
      %22 = vector.shape_cast %21 : vector<1xf32> to vector<1x1x1xf32>
      %23 = vector.extract %22[0, 0, 0] : f32 from vector<1x1x1xf32>
      %24 = vector.broadcast %23 : f32 to vector<1x1xf32>
      %25 = arith.addf %18, %24 : vector<1x1xf32>
      %c0_13 = arith.constant 0 : index
      %c0_14 = arith.constant 0 : index
      %26 = vector.load %arg5[%c0_13, %c0_14] : memref<1x1xf32, #tpu.memory_space<vmem>>, vector<1x1xf32>
      tpu.vector_store %arg5[%c0_13, %c0_14], %25 {strides = array<i32>} : memref<1x1xf32, #tpu.memory_space<vmem>>, vector<1x1xf32>,
      %c0_15 = arith.constant 0 : index
      %c0_16 = arith.constant 0 : index
      %27 = vector.load %arg6[%c0_15, %c0_16] : memref<1x1xf32, #tpu.memory_space<vmem>>, vector<1x1xf32>
      %28 = arith.mulf %17, %17 : vector<16x128xf32>
      %29 = vector.shape_cast %28 : vector<16x128xf32> to vector<1x16x128xf32>
      %cst_17 = arith.constant dense<0.000000e+00> : vector<1xf32>
      %30 = vector.multi_reduction <add>, %29, %cst_17 [1, 2] : vector<1x16x128xf32> to vector<1xf32>
      %31 = vector.shape_cast %30 : vector<1xf32> to vector<1x1x1xf32>
      %32 = vector.extract %31[0, 0, 0] : f32 from vector<1x1x1xf32>
      %33 = vector.broadcast %32 : f32 to vector<1x1xf32>
      %34 = arith.addf %27, %33 : vector<1x1xf32>
      %c0_18 = arith.constant 0 : index
      %c0_19 = arith.constant 0 : index
      %35 = vector.load %arg6[%c0_18, %c0_19] : memref<1x1xf32, #tpu.memory_space<vmem>>, vector<1x1xf32>
      tpu.vector_store %arg6[%c0_18, %c0_19], %34 {strides = array<i32>} : memref<1x1xf32, #tpu.memory_space<vmem>>, vector<1x1xf32>,
    } else {
    }
    %c1_i32 = arith.constant 1 : i32
    %8 = arith.cmpi eq, %arg0, %c1_i32 : i32
    %c0_i32_4 = arith.constant 0 : i32
    %9 = arith.cmpi eq, %arg1, %c0_i32_4 : i32
    %10 = arith.andi %8, %9 : i1
    %11 = arith.extui %10 : i1 to i32
    %c0_i32_5 = arith.constant 0 : i32
    %12 = arith.cmpi ne, %11, %c0_i32_5 : i32
    scf.if %12 {
      %c0 = arith.constant 0 : index
      %c0_8 = arith.constant 0 : index
      %16 = vector.load %arg5[%c0, %c0_8] : memref<1x1xf32, #tpu.memory_space<vmem>>, vector<1x1xf32>
      %c0_9 = arith.constant 0 : index
      %c0_10 = arith.constant 0 : index
      %17 = vector.load %arg6[%c0_9, %c0_10] : memref<1x1xf32, #tpu.memory_space<vmem>>, vector<1x1xf32>
      %cst = arith.constant 1.000000e+03 : f32
      %18 = vector.broadcast %cst : f32 to vector<1x1xf32>
      %19 = arith.mulf %17, %18 : vector<1x1xf32>
      %20 = arith.divf %16, %19 : vector<1x1xf32>
      %21 = math.sqrt %20 : vector<1x1xf32>
      %c0_11 = arith.constant 0 : index
      %c0_12 = arith.constant 0 : index
      %22 = vector.load %arg7[%c0_11, %c0_12] : memref<1x1xf32, #tpu.memory_space<vmem>>, vector<1x1xf32>
      tpu.vector_store %arg7[%c0_11, %c0_12], %21 {strides = array<i32>} : memref<1x1xf32, #tpu.memory_space<vmem>>, vector<1x1xf32>,
    } else {
    }
    %c1_i32_6 = arith.constant 1 : i32
    %13 = arith.cmpi eq, %arg0, %c1_i32_6 : i32
    %14 = arith.extui %13 : i1 to i32
    %c0_i32_7 = arith.constant 0 : i32
    %15 = arith.cmpi ne, %14, %c0_i32_7 : i32
    scf.if %15 {
      %c0 = arith.constant 0 : index
      %c0_8 = arith.constant 0 : index
      %16 = vector.load %arg2[%c0, %c0_8] : memref<16x128xf32, #tpu.memory_space<vmem>>, vector<16x128xf32>
      %c0_9 = arith.constant 0 : index
      %c0_10 = arith.constant 0 : index
      %17 = vector.load %arg3[%c0_9, %c0_10] : memref<16x128xf32, #tpu.memory_space<vmem>>, vector<16x128xf32>
      %c0_11 = arith.constant 0 : index
      %c0_12 = arith.constant 0 : index
      %18 = vector.load %arg7[%c0_11, %c0_12] : memref<1x1xf32, #tpu.memory_space<vmem>>, vector<1x1xf32>
      %19 = vector.broadcast %18 : vector<1x1xf32> to vector<16x128xf32>
      %20 = arith.mulf %19, %17 : vector<16x128xf32>
      %21 = arith.addf %16, %20 : vector<16x128xf32>
      %c0_13 = arith.constant 0 : index
      %c0_14 = arith.constant 0 : index
      %22 = vector.load %arg4[%c0_13, %c0_14] : memref<16x128xf32, #tpu.memory_space<vmem>>, vector<16x128xf32>
      tpu.vector_store %arg4[%c0_13, %c0_14], %21 {strides = array<i32>} : memref<16x128xf32, #tpu.memory_space<vmem>>, vector<16x128xf32>,
    } else {
    }
    return
  }
  func.func @transform_0(%arg0: i32, %arg1: i32) -> (i32, i32) {
    %c0_i32 = arith.constant 0 : i32
    %c0_i32_0 = arith.constant 0 : i32
    return %arg1, %c0_i32 : i32, i32
  }
  func.func @transform_1(%arg0: i32, %arg1: i32) -> (i32, i32) {
    %c0_i32 = arith.constant 0 : i32
    %c0_i32_0 = arith.constant 0 : i32
    return %arg1, %c0_i32 : i32, i32
  }
  func.func @transform_2(%arg0: i32, %arg1: i32) -> (i32, i32) {
    %0 = arith.muli %arg0, %arg1 : i32
    %c0_i32 = arith.constant 0 : i32
    %c0_i32_0 = arith.constant 0 : i32
    return %0, %c0_i32 : i32, i32
  }
}

</mosaic_0001>

<bundles_post_ra>
// kernel: tpu_custom_call.1
= control target key start
LH: loop header
LB: loop body
LE: loop exit
PB: predicated region body
PF: predicated region fallthrough
CT: control target
= control target key end

     0   :  { %7 = vsyncpa [#allocation6], 0  ;;  %s748_s0 = inlined_call_operand.hbm [shape: f32[16,128], index: 0, kind: input, shape index: {}]   ;;  %s749_s1 = inlined_call_operand.hbm [shape: f32[16,128], index: 1, kind: input, shape index: {}]   ;;  %s750_s2 = inlined_call_operand.hbm [shape: f32[16,128], index: 2, kind: output, shape index: {}]  }
   0x1   :  { %8 = vsyncpa [#allocation9], 0 }
   0x2   :  { %9 = vsyncpa [#allocation7], 0 }
   0x3   :  { %11 = vsyncpa [#allocation7 + $0x1], 0  ;;  %s609_s9 = smov 0   ;;  %s611_s10 = smov 0  }
   0x4   :  { %s613_s11 = smov 0  }
   0x5 LB: > { %s376_s12 = sadd.s32 4294967295, %s583_s11   ;;  %s377_s13 = sadd.s32 4294967294, %s583_s11   ;;  %s583_s11 = sphi %s613_s11, %s17_s11   ;;  %s579_s10 = sphi %s611_s10, %s761_s10   ;;  %s575_s9 = sphi %s609_s9, %s760_s9  }
   0x6   : > { %s29_s14 = sadd.s32 1, %s579_s10  ;;  %p378_p0 = scmp.ge.s32.totalorder %s583_s11, 1 }
   0x7   : > { %p31_p1 = scmp.ge.s32.totalorder %s29_s14, 2  ;;  %p114_p2 = scmp.lt.s32.totalorder %s583_s11, 3 }
   0x8   : > { %p631_p3 = scmp.eq.s32.totalorder %s376_s12, 0  ;;  %s585_s17 = smov [#allocation5]  }
   0x9   : > { %s763_s14 = smov (%p31_p1, %s29_s14), 0  ;;  %p637_p4 = pnand %p378_p0, %p114_p2 }
   0xa   : > { %s754_s15 = scalar_select %p631_p3, 1, 0 }
   0xb   : > { %s755_s16 = scalar_select %p637_p4, 1, 0 }
   0xc   : > { %s129_s18 = sshll.u32 %s585_s17, 4  ;;  %p411_p5 = pneg %p637_p4  ;;  %s130_s18 = int_to_ptr.vmem [resolvable:$true] %s129_s18 }
   0xd   : > { %s586_s20 = smov [#allocation8]   ;;  %s467_s24 = scalar_lea.hbm %s748_s0, 256 }
   0xe   : > { %p645_p6 = pnand %p631_p3, %p411_p5  ;;  %s145_s21 = sshll.u32 %s586_s20, 4  ;;  %s649_s21 = int_to_ptr.vmem [resolvable:$true] %s145_s21 }
   0xf   : > { %p468_p7 = scmp.ne.s32.totalorder %s748_s0, %s467_s24  ;;  %p474_p11 = scmp.lt.u32.totalorder %s467_s24, %s748_s0 }
  0x10   : > { %p469_p8 = pneg %p645_p6 }
  0x12   : > { %p470_p9 = pnand %p469_p8, %p468_p7 }
  0x14   : > { %p471_p10 = pneg %p470_p9 }
  0x16   : > { %p476_p12 = pnand %p474_p11, %p471_p10 }
  0x18   : > { %479 = shalt.err (!%p476_p12)
}
  0x19   : > { %s480_s29 = scalar_lea.vmem %s130_s18, 256  ;;  %p488_p2 = scmp.lt.s32.totalorder %s130_s18, %s130_s18 }
  0x1a   : > { %p481_p13 = scmp.ne.s32.totalorder %s130_s18, %s480_s29  ;;  %p489_p5 = scmp.lt.s32.totalorder %s480_s29, %s480_s29 }
  0x1c   : > { %p483_p0 = pnand %p481_p13, %p469_p8  ;;  %p490_p3 = por %p489_p5, %p488_p2 }
  0x1e   : > { %p484_p1 = pneg %p483_p0 }
  0x20   : > { %p491_p4 = pnand %p490_p3, %p484_p1 }
  0x22   : > { %494 = shalt.err (!%p491_p4)
}
  0x23   : > { %s587_s30 = smov 128   ;;  %s588_s3 = smov 8  }
  0x24   : > { %414 = dma.hbm_to_vmem [thread:$0]  (!%p645_p6), %s748_s0, 256, %s130_s18, [#allocation6], %s587_s30, %s587_s30, %s588_s3  }
  0x25   : > { %s495_s8 = scalar_lea.hbm %s749_s1, 256 }
  0x26   : > { %p496_p7 = scmp.ne.s32.totalorder %s749_s1, %s495_s8  ;;  %p502_p9 = scmp.lt.u32.totalorder %s495_s8, %s749_s1 }
  0x28   : > { %p498_p3 = pnand %p496_p7, %p469_p8 }
  0x2a   : > { %p499_p4 = pneg %p498_p3 }
  0x2c   : > { %p504_p10 = pnand %p502_p9, %p499_p4 }
  0x2e   : > { %507 = shalt.err (!%p504_p10)
}
  0x2f   : > { %s508_s18 = scalar_lea.vmem %s649_s21, 256  ;;  %p516_p0 = scmp.lt.s32.totalorder %s649_s21, %s649_s21 }
  0x30   : > { %p509_p11 = scmp.ne.s32.totalorder %s649_s21, %s508_s18  ;;  %p517_p1 = scmp.lt.s32.totalorder %s508_s18, %s508_s18 }
  0x32   : > { %p511_p12 = pnand %p509_p11, %p469_p8  ;;  %p518_p2 = por %p517_p1, %p516_p0 }
  0x34   : > { %p512_p13 = pneg %p511_p12 }
  0x36   : > { %p519_p5 = pnand %p518_p2, %p512_p13 }
  0x38   : > { %522 = shalt.err (!%p519_p5)
}
  0x39   : > { %417 = dma.hbm_to_vmem [thread:$0]  (!%p645_p6), %s749_s1, 256, %s649_s21, [#allocation9], %s587_s30, %s587_s30, %s588_s3  }
  0x3a   : > { %p757_p7 = scmp.ne.s32.totalorder %s755_s16, 0 }
  0x3b   : > { %p758_p3 = scmp.ne.s32.totalorder (!%p757_p7), %s754_s15, 0 }
  0x3c   : > { %161 = sbr.rel (%p757_p7) target bundleno = 499 (0x1f3), region = 28 }
  0x43   : > { %562 = dma.done.wait (%p758_p3), [#allocation6], 256  }
  0x44   : > { %564 = vsyncadd (%p758_p3), [#allocation6], 4294967040 }
  0x45   : > { %566 = dma.done.wait (%p758_p3), [#allocation9], 256  }
  0x46   : > { %568 = vsyncadd (%p758_p3), [#allocation9], 4294967040  ;;  %p186_p8 = scmp.eq.s32.totalorder %s575_s9, 0 }
  0x47   : > { %vm192_vm0 = vcmask (%p186_p8), 0   ;;  %v589_v0 = vmov (%p186_p8), 0.0  }
  0x48   : > { %191 = sbr.rel (!%p186_p8) target bundleno = 79 (0x4f), region = 40  ;;  %193 = vst.msk [vmem:[#allocation2] sm:$0x1] (%p186_p8), %vm192_vm0, %v589_v0  ;;  %194 = vst.msk [vmem:[#allocation3] sm:$0x1] (%p186_p8), %vm192_vm0, %v589_v0 }
  0x4f PF: > { %p385_p6 = scmp.ne.s32.totalorder %s575_s9, 0 }
  0x50   : > { %v198_v1 = vld [vmem:[#allocation5] sm:$0xff] (!%p385_p6)  ;;  %v199_v2 = vld [vmem:[#allocation5 + $0x8] sm:$0xff] (!%p385_p6)  ;;  %v200_v3 = vld [vmem:[#allocation8] sm:$0xff] (!%p385_p6)  ;;  %vm217_vm1 = vcmask (!%p385_p6), 0  }
  0x51   : > { %197 = sbr.rel (%p385_p6) target bundleno = 297 (0x129), region = 44  ;;  %v203_v4 = vmul.f32 (!%p385_p6), %v198_v1, %v198_v1  ;;  %v204_v5 = vmul.f32 (!%p385_p6), %v199_v2, %v199_v2  ;;  %v201_v6 = vld [vmem:[#allocation8 + $0x8] sm:$0xff] (!%p385_p6)  ;;  %v220_v7 = vmul.f32 (!%p385_p6), %v200_v3, %v200_v3 }
  0x52   : > { %v221_v8 = vmul.f32 (!%p385_p6), %v201_v6, %v201_v6  ;;  %v202_v25 = vld [vmem:[#allocation2] sm:$0x1] (!%p385_p6)  ;;  %v219_v28 = vld [vmem:[#allocation3] sm:$0x1] (!%p385_p6) }
  0x53   : > { %v205_v9 = vadd.f32 (!%p385_p6), %v204_v5, %v203_v4 }
  0x54   : > { %v222_v10 = vadd.f32 (!%p385_p6), %v221_v8, %v220_v7 }
  0x55   : > { %206 = vadd.xlane.f32.xlu0 (!%p385_p6), %v205_v9 }
  0x59   : > { %223 = vadd.xlane.f32.xlu0 %v222_v10 }
  0xe2   : > { %v207_v11 = vpop.xlane.xlu0 %206 }
  0xe3   : > { %v208_v12 = vrot.slane %v207_v11, 4 }
  0xe5   : > { %v209_v13 = vadd.f32 %v208_v12, %v207_v11 }
  0xe6   : > { %v224_v14 = vpop.xlane.xlu0 %223 }
  0xe7   : > { %v210_v15 = vrot.slane %v209_v13, 2  ;;  %v225_v16 = vrot.slane %v224_v14, 4 }
  0xe9   : > { %v226_v17 = vadd.f32 %v225_v16, %v224_v14  ;;  %v211_v18 = vadd.f32 %v210_v15, %v209_v13 }
  0xeb   : > { %v227_v19 = vrot.slane %v226_v17, 2  ;;  %v212_v20 = vrot.slane %v211_v18, 1 }
  0xed   : > { %v228_v21 = vadd.f32 %v227_v19, %v226_v17  ;;  %v213_v22 = vadd.f32 %v212_v20, %v211_v18 }
  0xef   : > { %395 = vpush %v213_v22  ;;  %v229_v23 = vrot.slane %v228_v21, 1 }
  0xf1   : > { %v230_v24 = vadd.f32 %v229_v23, %v228_v21 }
  0xf3   : > { %397 = vpush %v230_v24 }
 0x120   : > { %s396_s15 = spop %395 }
 0x121   : > { %v215_v26 = vstv %s396_s15 }
 0x122   : > { %v216_v27 = vadd.f32 %v215_v26, %v202_v25 }
 0x124   : > { %218 = vst.msk [vmem:[#allocation2] sm:$0x1] %vm217_vm1, %v216_v27  ;;  %s398_s16 = spop %397 }
 0x125   : > { %v232_v29 = vstv %s398_s16 }
 0x126   : > { %v233_v30 = vadd.f32 %v232_v29, %v219_v28 }
 0x128   : > { %234 = vst.msk [vmem:[#allocation3] sm:$0x1] %vm217_vm1, %v233_v30 }
 0x129 PF: > { %p235_p4 = scmp.eq.s32.totalorder %s575_s9, 1 }
 0x12a   : > { %vm252_vm4 = vcmask (%p235_p4), 0  }
 0x12b   : > { %239 = sbr.rel (!%p235_p4) target bundleno = 335 (0x14f), region = 48  ;;  %v240_v33 = vld [vmem:[#allocation2] sm:$0x1] (%p235_p4) }
 0x12f   : > { %v241_v31 = vld [vmem:[#allocation3] sm:$0x1] (%p235_p4) }
 0x130   : > { %v242_v32 = vmul.f32 (%p235_p4), 1000.0, %v241_v31 }
 0x132   : > { %462 = vrcp.f32 %v242_v32 }
 0x13c   : > { %v463_v34 = vpop.eup %462 }
 0x13d   : > { %v244_v35 = vmul.f32 %v463_v34, %v240_v33 }
 0x13f   : > { %464 = vrsqrt.f32 %v244_v35  ;;  %vm247_vm2 = vcmp.eq.f32.partialorder %v244_v35, inf  ;;  %v250_v37 = vand.u32 2147483648, %v244_v35  ;;  %vm249_vm3 = vcmp.eq.f32.partialorder %v244_v35, 0.0 }
 0x149   : > { %v465_v36 = vpop.eup %464 }
 0x14a   : > { %v246_v38 = vmul.f32 %v465_v36, %v244_v35 }
 0x14c   : > { %v248_v39 = vsel %vm247_vm2, %v244_v35, %v246_v38 }
 0x14d   : > { %v251_v40 = vsel %vm249_vm3, %v250_v37, %v248_v39 }
 0x14e   : > { %253 = vst.msk [vmem:[#allocation4] sm:$0x1] %vm252_vm4, %v251_v40 }
 0x14f PF: > { %p387_p9 = scmp.ne.s32.totalorder %s575_s9, 1 }
 0x150   : > { %v590_v42 = vmov (!%p387_p9), 0   ;;  %v259_v43 = vld [vmem:[#allocation8] sm:$0xff] (!%p387_p9)  ;;  %v260_v44 = vld [vmem:[#allocation8 + $0x8] sm:$0xff] (!%p387_p9)  ;;  %v257_v46 = vld [vmem:[#allocation5] sm:$0xff] (!%p387_p9) }
 0x151   : > { %256 = sbr.rel (%p387_p9) target bundleno = 475 (0x1db), region = 52  ;;  %466 = vset.pattern.permute.xlu0 (!%p387_p9), %v590_v42  ;;  %v258_v47 = vld [vmem:[#allocation5 + $0x8] sm:$0xff] (!%p387_p9) }
 0x155   : > { %v388_v41 = vld [vmem:[#allocation4] ss:$0 sm:$0xff] (!%p387_p9) }
 0x156   : > { %268 = vperm.xlu0 (!%p387_p9), %466, %v388_v41  }
 0x1d5   : > { %v269_v45 = vpop.permute.xlu0 %268 }
 0x1d6   : > { %v271_v48 = vmul.f32 %v269_v45, %v259_v43  ;;  %v272_v49 = vmul.f32 %v269_v45, %v260_v44 }
 0x1d8   : > { %v273_v50 = vadd.f32 %v271_v48, %v257_v46  ;;  %v274_v51 = vadd.f32 %v272_v49, %v258_v47 }
 0x1da   : > { %275 = vst [vmem:[#allocation10] sm:$0xff] %v273_v50  ;;  %276 = vst [vmem:[#allocation10 + $0x8] sm:$0xff] %v274_v51 }
 0x1db PF: > { %p714_p10 = scmp.eq.s32.totalorder %s376_s12, 1  ;;  %s591_s19 = smov [#allocation10]  }
 0x1dc   : > { %s292_s21 = sshll.u32 %s591_s19, 4  ;;  %s293_s21 = int_to_ptr.vmem [resolvable:$true] %s292_s21 }
 0x1dd   : > { %s523_s26 = scalar_lea.vmem %s293_s21, 256  ;;  %s529_s27 = scalar_lea.vmem %s293_s21, 512 }
 0x1de   : > { %p524_p11 = scmp.ne.s32.totalorder %s293_s21, %s523_s26  ;;  %p530_p0 = scmp.lt.s32.totalorder %s293_s21, %s293_s21 }
 0x1df   : > { %p531_p1 = scmp.lt.s32.totalorder %s529_s27, %s523_s26 }
 0x1e0   : > { %p525_p12 = pnand %p524_p11, %p714_p10 }
 0x1e1   : > { %p532_p2 = por %p531_p1, %p530_p0 }
 0x1e2   : > { %p526_p13 = pneg %p525_p12 }
 0x1e4   : > { %p533_p5 = pnand %p532_p2, %p526_p13 }
 0x1e6   : > { %536 = shalt.err (!%p533_p5)
}
 0x1e7   : > { %s537_s29 = scalar_lea.hbm %s750_s2, 256 }
 0x1e8   : > { %p538_p7 = scmp.ne.s32.totalorder %s750_s2, %s537_s29  ;;  %p543_p6 = scmp.lt.u32.totalorder %s537_s29, %s750_s2 }
 0x1ea   : > { %p539_p3 = pnand %p538_p7, %p714_p10 }
 0x1ec   : > { %p540_p8 = pneg %p539_p3 }
 0x1ee   : > { %p545_p4 = pnand %p543_p6, %p540_p8 }
 0x1f0   : > { %548 = shalt.err (!%p545_p4)
}
 0x1f1   : > { %s592_s6 = smov 128   ;;  %s593_s7 = smov 8  }
 0x1f2   : > { %408 = dma.vmem_to_hbm [thread:$0]  (%p714_p10), %s293_s21, 256, %s750_s2, [#allocation7], %s592_s6, %s592_s6, %s593_s7  }
 0x1f3 PF: > { %p427_p9 = scmp.ge.s32.totalorder %s583_s11, 2  ;;  %p428_p11 = scmp.eq.s32.totalorder %s377_s13, 1 }
 0x1f5   : > { %p419_p12 = pnand %p428_p11, %p427_p9 }
 0x1f7   : > { %570 = dma.done.wait (!%p419_p12), [#allocation7], 256  }
 0x1f8   : > { %572 = vsyncadd (!%p419_p12), [#allocation7], 4294967040  ;;  %s17_s11 = sadd.s32 1, %s583_s11   ;;  %s760_s9 = smov %s579_s10 }
 0x1f9   : > { %p14_p13 = scmp.ge.s32.totalorder %s17_s11, 4   ;;  %s761_s10 = smov %s763_s14 }
 0x1fb   :  { %16 = sbr.rel (!%p14_p13) target bundleno = 5 (0x5), region = 87 }
 0x202   :  { %313 = vsyncpa [#allocation6], 1 }
 0x203   :  { %315 = vsyncpa [#allocation6 + $0x1], 1 }
 0x204   :  { %316 = vsyncpa [#allocation9], 1 }
 0x205   :  { %317 = vsyncpa [#allocation7], 1 }
 0x206   :  { %319 = vsyncpa [#allocation7 + $0x1], 1 }

</bundles_post_ra>
